<compile_context>
chip_gen: v6e
topology: v6e:2x2x1
jax: 0.10.0
libtpu: 0.0.40
codegen_flags: <defaults>
</compile_context>

<pallas_src>
import jax
import jax.numpy as jnp
from jax.experimental import pallas as pl
from jax.experimental.pallas import tpu as pltpu


_COLS = 128          # lane dimension of the flattened slab (full vreg width)
_MAX_TILE_ROWS = 4096  # (4096, 128) f32 = 2 MiB per input per pipeline buffer


def _round_up(v, m):
    return ((v + m - 1) // m) * m


def _mse_partial_kernel(x_ref, t_ref, out_ref):
    # Squared difference in f32 regardless of input dtype.
    d = x_ref[...].astype(jnp.float32) - t_ref[...].astype(jnp.float32)
    sq = d * d
    tr = sq.shape[0]
    # Fold rows into a single vreg-shaped (8, 128) partial: reshaping along the
    # leading (sublane-major) axis keeps (8,128) tiles intact, so the reduce is
    # plain VPU adds across vregs — no per-step cross-lane XLU reduction and no
    # masked (1,1) scalar store.
    part = jnp.sum(sq.reshape(tr // 8, 8, _COLS), axis=0)
    out_ref[...] = part.reshape(1, 8, _COLS)


def _mse_sse_partials(x2d, t2d, tile_rows):
    rows, cols = x2d.shape
    grid = (rows // tile_rows,)
    n_elems = rows * cols
    bytes_in = n_elems * (x2d.dtype.itemsize + t2d.dtype.itemsize)
    bytes_out = grid[0] * 8 * cols * 4
    return pl.pallas_call(
        _mse_partial_kernel,
        out_shape=jax.ShapeDtypeStruct((grid[0], 8, cols), jnp.float32),
        grid_spec=pltpu.PrefetchScalarGridSpec(
            num_scalar_prefetch=0,
            grid=grid,
            in_specs=[
                pl.BlockSpec((tile_rows, cols), lambda i: (i, 0)),
                pl.BlockSpec((tile_rows, cols), lambda i: (i, 0)),
            ],
            # Each grid step owns its own (8,128) partial-sum block -> no
            # resident accumulator, grid axis can be parallel.
            out_specs=pl.BlockSpec((1, 8, cols), lambda i: (i, 0, 0)),
        ),
        compiler_params=pltpu.CompilerParams(
            dimension_semantics=("parallel",),
        ),
        cost_estimate=pl.CostEstimate(
            flops=3 * n_elems,          # sub + mul + add per element
            transcendentals=0,
            bytes_accessed=bytes_in + bytes_out,
        ),
    )(x2d, t2d)


def _flatten_pad(a, rows_padded, cols):
    flat = a.reshape(-1)
    pad = rows_padded * cols - flat.shape[0]
    if pad:
        flat = jnp.pad(flat, (0, pad))
    return flat.reshape(rows_padded, cols)


def _mse_loss_impl(x, target):
    total = x.size                                  # static Python int
    rows = -(-total // _COLS)                       # ceil(total / 128)
    tile_rows = min(_MAX_TILE_ROWS, _round_up(rows, 8))
    rows_padded = _round_up(rows, tile_rows)

    x2d = _flatten_pad(x, rows_padded, _COLS)
    t2d = _flatten_pad(target, rows_padded, _COLS)

    partials = _mse_sse_partials(x2d, t2d, tile_rows)   # (grid, 8, 128) f32
    sse = jnp.sum(partials)                             # tiny final reduce
    return sse / jnp.float32(total)


@jax.custom_vjp
def mse_loss(x, target):
    """mean((x - target)**2) with a Pallas forward and analytic backward."""
    return _mse_loss_impl(x, target)


def _mse_fwd(x, target):
    return _mse_loss_impl(x, target), (x, target)


def _mse_bwd(res, g):
    x, target = res
    d = x.astype(jnp.float32) - target.astype(jnp.float32)
    scale = (2.0 / x.size) * g
    gx = (scale * d).astype(x.dtype)
    gt = (-(scale * d)).astype(target.dtype)
    return gx, gt


mse_loss.defvjp(_mse_fwd, _mse_bwd)


class ContentLoss:
    """JAX/Pallas port of the PyTorch ContentLoss module.

    __init__ stores a detached target; __call__ computes
    self.loss = mse_loss(input, target) and returns input unchanged.

    Note: like the PyTorch original, the loss is stored as module state; under
    jax.jit this attribute will hold a tracer — read it immediately after the
    call (outside jit) or restructure to return it explicitly.
    """

    def __init__(self, target):
        # detach() equivalent: treat target as a constant.
        self.target = jax.lax.stop_gradient(target)
        self.loss = None

    def __call__(self, x):
        assert x.shape == self.target.shape, "input/target shape mismatch"
        self.loss = mse_loss(x, self.target)
        # Module forward returns its input untouched (transparent pass-through).
        return x


if __name__ == "__main__":
    key = jax.random.PRNGKey(0)
    k1, k2 = jax.random.split(key)

    # Small shapes consistent with a conv feature map: [N, C, H, W]
    x = jax.random.normal(k1, (2, 4, 16, 16), dtype=jnp.float32)
    target = jax.random.normal(k2, (2, 4, 16, 16), dtype=jnp.float32)

    module = ContentLoss(target)
    out = module(x)

    out = jax.block_until_ready(out)
    loss = jax.block_until_ready(module.loss)

    # Sanity check against pure-JAX reference (mirrors F.mse_loss default 'mean')
    ref_loss = jnp.mean((x - target) ** 2)
    assert jnp.allclose(loss, ref_loss, rtol=1e-5, atol=1e-6), (loss, ref_loss)
    assert jnp.array_equal(out, x), "forward must return input unchanged"

    # Gradient path (custom VJP): d/dx mean((x-t)^2) = 2*(x-t)/N
    gx = jax.grad(lambda xx: mse_loss(xx, target))(x)
    gx = jax.block_until_ready(gx)
    ref_gx = 2.0 * (x - target) / x.size
    assert jnp.allclose(gx, ref_gx, rtol=1e-5, atol=1e-6), "bad custom VJP"

    print("KERNEL_OK")
</pallas_src>

<mosaic_0001>
module attributes {stable_mosaic.version = 11 : i64} {
  func.func @_mse_partial_kernel(%arg0: i32, %arg1: memref<16x128xf32, #tpu.memory_space<vmem>>, %arg2: memref<16x128xf32, #tpu.memory_space<vmem>>, %arg3: memref<1x8x128xf32, #tpu.memory_space<vmem>>) attributes {dimension_semantics = [#tpu.dimension_semantics<parallel>], iteration_bounds = array<i64: 1>, scalar_prefetch = 0 : i64, scratch_operands = 0 : i64, tpu.core_type = #tpu.core_type<tc>, window_params = [{transform_indices = @transform_0, window_bounds = array<i64: 16, 128>}, {transform_indices = @transform_1, window_bounds = array<i64: 16, 128>}, {transform_indices = @transform_2, window_bounds = array<i64: 1, 8, 128>}]} {
    %c0 = arith.constant 0 : index
    %c0_0 = arith.constant 0 : index
    %0 = vector.load %arg1[%c0, %c0_0] : memref<16x128xf32, #tpu.memory_space<vmem>>, vector<16x128xf32>
    %c0_1 = arith.constant 0 : index
    %c0_2 = arith.constant 0 : index
    %1 = vector.load %arg2[%c0_1, %c0_2] : memref<16x128xf32, #tpu.memory_space<vmem>>, vector<16x128xf32>
    %2 = arith.subf %0, %1 : vector<16x128xf32>
    %3 = arith.mulf %2, %2 : vector<16x128xf32>
    %4 = vector.shape_cast %3 : vector<16x128xf32> to vector<2x8x128xf32>
    %cst = arith.constant dense<0.000000e+00> : vector<8x128xf32>
    %5 = vector.multi_reduction <add>, %4, %cst [0] : vector<2x8x128xf32> to vector<8x128xf32>
    %6 = vector.shape_cast %5 : vector<8x128xf32> to vector<1x8x128xf32>
    %c0_3 = arith.constant 0 : index
    %c0_4 = arith.constant 0 : index
    %c0_5 = arith.constant 0 : index
    %7 = vector.load %arg3[%c0_3, %c0_4, %c0_5] : memref<1x8x128xf32, #tpu.memory_space<vmem>>, vector<1x8x128xf32>
    tpu.vector_store %arg3[%c0_3, %c0_4, %c0_5], %6 {strides = array<i32>} : memref<1x8x128xf32, #tpu.memory_space<vmem>>, vector<1x8x128xf32>,
    return
  }
  func.func @transform_0(%arg0: i32) -> (i32, i32) {
    %c0_i32 = arith.constant 0 : i32
    %c0_i32_0 = arith.constant 0 : i32
    return %arg0, %c0_i32 : i32, i32
  }
  func.func @transform_1(%arg0: i32) -> (i32, i32) {
    %c0_i32 = arith.constant 0 : i32
    %c0_i32_0 = arith.constant 0 : i32
    return %arg0, %c0_i32 : i32, i32
  }
  func.func @transform_2(%arg0: i32) -> (i32, i32, i32) {
    %c0_i32 = arith.constant 0 : i32
    %c0_i32_0 = arith.constant 0 : i32
    %c0_i32_1 = arith.constant 0 : i32
    return %arg0, %c0_i32, %c0_i32_0 : i32, i32, i32
  }
}

</mosaic_0001>

<bundles_post_ra>
// kernel: tpu_custom_call.1
= control target key start
LH: loop header
LB: loop body
LE: loop exit
PB: predicated region body
PF: predicated region fallthrough
CT: control target
= control target key end

     0   :  { %7 = vsyncpa [#allocation3], 0  ;;  %s166_s0 = inlined_call_operand.hbm [shape: f32[16,128], index: 0, kind: input, shape index: {}]   ;;  %s167_s1 = inlined_call_operand.hbm [shape: f32[16,128], index: 1, kind: input, shape index: {}]   ;;  %s168_s2 = inlined_call_operand.hbm [shape: f32[1,8,128], index: 2, kind: output, shape index: {}]  }
   0x1   :  { %8 = vsyncpa [#allocation6], 0 }
   0x2   :  { %9 = vsyncpa [#allocation4], 0  ;;  %s137_s9 = smov [#allocation2]  }
   0x3   :  { %s15_s10 = sshll.u32 %s137_s9, 4  ;;  %s16_s10 = int_to_ptr.vmem [resolvable:$true] %s15_s10 }
   0x4   :  { %s79_s11 = scalar_lea.vmem %s16_s10, 256  ;;  %p84_p1 = scmp.lt.s32.totalorder %s16_s10, %s16_s10 }
   0x5   :  { %p80_p0 = scmp.ne.s32.totalorder %s16_s10, %s79_s11  ;;  %p85_p2 = scmp.lt.s32.totalorder %s79_s11, %s79_s11 }
   0x7   :  { %p86_p3 = por %p85_p2, %p84_p1 }
   0x9   :  { %p87_p4 = pnand %p86_p3, %p80_p0 }
   0xb   :  { %90 = shalt.err (!%p87_p4)
}
   0xc   :  { %s138_s12 = smov 128   ;;  %s139_s13 = smov 8  }
   0xd   :  { %21 = dma.hbm_to_vmem [thread:$0]  %s166_s0, 256, %s16_s10, [#allocation3], %s138_s12, %s138_s12, %s139_s13  }
   0xe   :  { %s140_s16 = smov [#allocation5]  }
   0xf   :  { %s27_s17 = sshll.u32 %s140_s16, 4  ;;  %s28_s17 = int_to_ptr.vmem [resolvable:$true] %s27_s17 }
  0x10   :  { %s99_s18 = scalar_lea.vmem %s28_s17, 256  ;;  %p104_p6 = scmp.lt.s32.totalorder %s28_s17, %s28_s17 }
  0x11   :  { %p100_p5 = scmp.ne.s32.totalorder %s28_s17, %s99_s18  ;;  %p105_p7 = scmp.lt.s32.totalorder %s99_s18, %s99_s18 }
  0x13   :  { %p106_p8 = por %p105_p7, %p104_p6 }
  0x15   :  { %p107_p9 = pnand %p106_p8, %p100_p5 }
  0x17   :  { %110 = shalt.err (!%p107_p9)
}
  0x18   :  { %33 = dma.hbm_to_vmem [thread:$0]  %s167_s1, 256, %s28_s17, [#allocation6], %s138_s12, %s138_s12, %s139_s13  }
  0x19   :  { %131 = dma.done.wait [#allocation3], 256  }
  0x1a   :  { %132 = vsyncadd [#allocation3], 4294967040 }
  0x1b   :  { %133 = dma.done.wait [#allocation6], 256  }
  0x1c   :  { %134 = vsyncadd [#allocation6], 4294967040  ;;  %v40_v0 = vld [vmem:[#allocation2] sm:$0xff]  ;;  %v41_v1 = vld [vmem:[#allocation2 + $0x8] sm:$0xff]  ;;  %s141_s0 = smov [#allocation7]  }
  0x1d   :  { %v42_v2 = vld [vmem:[#allocation5] sm:$0xff]  ;;  %v43_v3 = vld [vmem:[#allocation5 + $0x8] sm:$0xff]  ;;  %s56_s21 = sshll.u32 %s141_s0, 4  ;;  %s57_s21 = int_to_ptr.vmem [resolvable:$true] %s56_s21 }
  0x1e   :  { %v44_v4 = vsub.f32 %v40_v0, %v42_v2  ;;  %v45_v5 = vsub.f32 %v41_v1, %v43_v3  ;;  %s111_s22 = scalar_lea.vmem %s57_s21, 128  ;;  %p116_p11 = scmp.lt.s32.totalorder %s57_s21, %s57_s21 }
  0x1f   :  { %p112_p10 = scmp.ne.s32.totalorder %s57_s21, %s111_s22  ;;  %p117_p12 = scmp.lt.s32.totalorder %s111_s22, %s111_s22 }
  0x20   :  { %v46_v6 = vmul.f32 %v44_v4, %v44_v4  ;;  %v47_v7 = vmul.f32 %v45_v5, %v45_v5 }
  0x21   :  { %p118_p13 = por %p117_p12, %p116_p11 }
  0x22   :  { %v48_v8 = vadd.f32 %v47_v7, %v46_v6 }
  0x23   :  { %p119_p0 = pnand %p118_p13, %p112_p10 }
  0x24   :  { %49 = vst [vmem:[#allocation7] sm:$0xff] %v48_v8 }
  0x25   :  { %122 = shalt.err (!%p119_p0)
}
  0x26   :  { %59 = dma.vmem_to_hbm [thread:$0]  %s57_s21, 128, %s168_s2, [#allocation4]  }
  0x27   :  { %135 = dma.done.wait [#allocation4], 128  }
  0x28   :  { %136 = vsyncadd [#allocation4], 4294967168 }
  0x29   :  { %63 = vsyncpa [#allocation3], 1 }
  0x2a   :  { %64 = vsyncpa [#allocation6], 1 }
  0x2b   :  { %65 = vsyncpa [#allocation4], 1 }

</bundles_post_ra>
